<compile_context>
chip_gen: v7x
topology: tpu7x:2x2x1
jax: 0.10.0
libtpu: 0.0.40
codegen_flags: <defaults>
</compile_context>

<pallas_src>
import math
from functools import partial

import jax
import jax.numpy as jnp
from jax.experimental import pallas as pl
from jax.experimental.pallas import tpu as pltpu


# ---------------------------------------------------------------------------
# Host-side constant ("weight") preparation — mirrors TextureSuppressionLayer.__init__.
# ---------------------------------------------------------------------------

def _gaussian_kernel(sigma_x, sigma_y, theta, size=21):
    half = size // 2
    r = jnp.arange(-half, half + 1, dtype=jnp.float32)
    xx, yy = jnp.meshgrid(r, r, indexing="ij")
    ct = jnp.cos(jnp.float32(theta))
    st = jnp.sin(jnp.float32(theta))
    xx_rot = xx * ct + yy * st
    yy_rot = -xx * st + yy * ct
    k = jnp.exp(-0.5 * (xx_rot ** 2 / sigma_x ** 2 + yy_rot ** 2 / sigma_y ** 2))
    return k / jnp.sum(k)


def build_gaussian_kernels(n_thetas=8, sigmax=3.65, surround_scale=3.0, size=21):
    sigmay = sigmax / 8.0
    centers, surrounds = [], []
    for t in range(n_thetas):
        theta = t * math.pi / n_thetas
        centers.append(_gaussian_kernel(sigmax, sigmay, theta, size))
        surrounds.append(
            _gaussian_kernel(sigmax * surround_scale, sigmay * surround_scale, theta, size))
    return jnp.stack(centers), jnp.stack(surrounds)


def _conv_matrix(k2d, H, W):
    """(HW, HW) matrix M with (a_flat @ M) == conv2d(a, k2d, padding='same') (cross-correlation)."""
    size = k2d.shape[0]
    half = size // 2
    ii, jj = jnp.meshgrid(jnp.arange(H), jnp.arange(W), indexing="ij")
    pi = ii.reshape(-1)
    pj = jj.reshape(-1)
    di = pi[:, None] - pi[None, :] + half        # [input pixel q, output pixel p]
    dj = pj[:, None] - pj[None, :] + half
    valid = (di >= 0) & (di < size) & (dj >= 0) & (dj < size)
    vals = k2d[jnp.clip(di, 0, size - 1), jnp.clip(dj, 0, size - 1)]
    return jnp.where(valid, vals, 0.0).astype(jnp.float32)


def _pool_matrix(H, W):
    """(HW, HW) symmetric matrix P with (a_flat @ P) == avg_pool2d(a, ps, stride=1, pad=ps//2)."""
    assert H >= 4, "pool_size = min(3, H//4) requires H >= 4 (matches the PyTorch module's constraint)"
    ps = min(3, H // 4)
    if ps % 2 == 0:
        ps -= 1
    r = ps // 2
    ih = jnp.arange(H)
    iw = jnp.arange(W)
    a_h = (jnp.abs(ih[:, None] - ih[None, :]) <= r).astype(jnp.float32)
    a_w = (jnp.abs(iw[:, None] - iw[None, :]) <= r).astype(jnp.float32)
    return jnp.kron(a_h, a_w) / float(ps * ps)


# ---------------------------------------------------------------------------
# Pallas kernels.
# ---------------------------------------------------------------------------

def _stats_kernel(x_ref, p_ref, o_ref, *, batch, channels):
    # x_ref: (B*C, HW) f32 in native (b-major, c-minor) row order.
    # p_ref: (HW, HW)  f32 avg-pool matrix.
    # o_ref: (B*C, HW) f32 normalized local std.
    rows = batch * channels
    a = x_ref[...]
    p = p_ref[...]

    # Fuse avg and avg^2 pools into ONE MXU matmul (M = 2*B*C).  Keep f32: avg_sq - avg^2 is
    # cancellation-prone, so no bf16 on this path.
    stacked = jnp.concatenate([a, a * a], axis=0)                       # (2*B*C, HW)
    pooled = jnp.dot(stacked, p, preferred_element_type=jnp.float32)
    avg = pooled[:rows]
    avg_sq = pooled[rows:]
    local_std = jnp.sqrt(jnp.maximum(avg_sq - avg * avg, 1e-6))         # (B*C, HW)

    # Per-channel min/max over the whole (batch, HW) slab.  Rows are b-major / c-minor, so reduce
    # each row over lanes, then fold the B row-groups together with static sublane slices.
    row_min = jnp.min(local_std, axis=1, keepdims=True)                 # (B*C, 1)
    row_max = jnp.max(local_std, axis=1, keepdims=True)
    ch_min = row_min[0:channels]
    ch_max = row_max[0:channels]
    for b in range(1, batch):
        ch_min = jnp.minimum(ch_min, row_min[b * channels:(b + 1) * channels])
        ch_max = jnp.maximum(ch_max, row_max[b * channels:(b + 1) * channels])
    ch_min_rows = jnp.concatenate([ch_min] * batch, axis=0)             # (B*C, 1)
    ch_max_rows = jnp.concatenate([ch_max] * batch, axis=0)

    norm = (local_std - ch_min_rows) / (ch_max_rows - ch_min_rows + 1e-8)
    o_ref[...] = norm.astype(o_ref.dtype)


def _suppress_kernel(x_ref, ls_ref, m_ref, o_ref):
    # x_ref / ls_ref / o_ref: (nB, 1, C, HW) — all batches sharing this grid step's theta.
    # m_ref: (1, HW, 2*HW) bf16 — [center | surround] conv matrix for this theta.
    nb, _, c, hw = x_ref.shape
    a = x_ref[...].reshape(nb * c, hw)                                  # bf16 activations
    ls = ls_ref[...].reshape(nb * c, hw)                                # f32 normalized local std

    # Single MXU matmul per step: center and surround responses in one (nB*C, 2*HW) result.
    resp = jnp.dot(a, m_ref[0], preferred_element_type=jnp.float32)
    center = resp[:, :hw]
    surround = resp[:, hw:]

    out = jnp.maximum(center - ls * surround, 0.0)                      # f32 epilogue
    o_ref[...] = out.reshape(o_ref.shape).astype(o_ref.dtype)


# ---------------------------------------------------------------------------
# Wrapper.
# ---------------------------------------------------------------------------

def texture_suppression(x, n_thetas=8):
    B, C, H, W = x.shape
    HW = H * W
    out_dtype = x.dtype

    # Constant matrices (pure weight prep from the module's precomputed buffers).
    kc, ks = build_gaussian_kernels(n_thetas)
    m_center = jnp.stack([_conv_matrix(kc[t], H, W) for t in range(n_thetas)])    # (nT, HW, HW)
    m_surround = jnp.stack([_conv_matrix(ks[t], H, W) for t in range(n_thetas)])  # (nT, HW, HW)
    # One (HW, 2*HW) RHS per theta, bf16: halves matrix DMA bytes, one dot per grid step.
    m_cs = jnp.concatenate([m_center, m_surround], axis=-1).astype(jnp.bfloat16)  # (nT, HW, 2*HW)
    p_pool = _pool_matrix(H, W)                                                   # (HW, HW) f32

    # ---- Pass 1: normalized local std, native (B, C, HW) layout, single whole-slab step --------
    x_flat = x.reshape(B * C, HW).astype(jnp.float32)        # free reshape, no transpose
    ls_flat = pl.pallas_call(
        partial(_stats_kernel, batch=B, channels=C),
        out_shape=jax.ShapeDtypeStruct((B * C, HW), jnp.float32),
        grid_spec=pltpu.PrefetchScalarGridSpec(
            num_scalar_prefetch=0,
            grid=(1,),
            in_specs=[
                pl.BlockSpec((B * C, HW), lambda i: (0, 0)),
                pl.BlockSpec((HW, HW), lambda i: (0, 0)),
            ],
            out_specs=pl.BlockSpec((B * C, HW), lambda i: (0, 0)),
        ),
        compiler_params=pltpu.CompilerParams(
            dimension_semantics=("arbitrary",),
            vmem_limit_bytes=64 * 1024 * 1024),
    )(x_flat, p_pool)

    # ---- Group batches by theta (theta = b % nThetas) via a FREE reshape -----------------------
    # b = g*nThetas + t  =>  (B_pad, C, HW) -> (nB, T_used, C, HW) puts every batch of theta t in
    # group column t.  Padded rows (zeros) are computed but sliced away at the end.
    nB = -(-B // n_thetas)                 # ceil(B / nThetas)
    T_used = min(B, n_thetas)              # thetas that actually occur
    B_eff = nB * T_used

    def group_by_theta(z):                 # (B, C, HW) -> (nB, T_used, C, HW)
        if B_eff > B:
            z = jnp.concatenate([z, jnp.zeros((B_eff - B, C, HW), z.dtype)], axis=0)
        return z.reshape(nB, T_used, C, HW)

    x_grp = group_by_theta(x.reshape(B, C, HW).astype(jnp.bfloat16))   # bf16 matmul operand
    ls_grp = group_by_theta(ls_flat.reshape(B, C, HW))                 # f32 epilogue operand

    # ---- Pass 2: oriented center/surround + suppression, grid over thetas ----------------------
    out_grp = pl.pallas_call(
        _suppress_kernel,
        out_shape=jax.ShapeDtypeStruct((nB, T_used, C, HW), out_dtype),
        grid_spec=pltpu.PrefetchScalarGridSpec(
            num_scalar_prefetch=0,
            grid=(T_used,),
            in_specs=[
                pl.BlockSpec((nB, 1, C, HW), lambda t: (0, t, 0, 0)),
                pl.BlockSpec((nB, 1, C, HW), lambda t: (0, t, 0, 0)),
                pl.BlockSpec((1, HW, 2 * HW), lambda t: (t, 0, 0)),     # one matrix fetch per theta
            ],
            out_specs=pl.BlockSpec((nB, 1, C, HW), lambda t: (0, t, 0, 0)),
        ),
        compiler_params=pltpu.CompilerParams(
            dimension_semantics=("parallel",),          # steps independent -> 2-TC split on v7x
            vmem_limit_bytes=64 * 1024 * 1024),
    )(x_grp, ls_grp, m_cs)

    return out_grp.reshape(B_eff, C, HW)[:B].reshape(B, C, H, W)


# ---------------------------------------------------------------------------
# Pure-JAX reference matching the PyTorch module's semantics.
# ---------------------------------------------------------------------------

def texture_suppression_reference(x, kc, ks, n_thetas):
    B, C, H, W = x.shape
    ps = min(3, H // 4)
    if ps % 2 == 0:
        ps -= 1
    pad = ps // 2

    def avg_pool(z):                      # z: (B, H, W); count_include_pad, stride 1
        zp = jnp.pad(z, ((0, 0), (pad, pad), (pad, pad)))
        s = jnp.zeros_like(z)
        for du in range(ps):
            for dv in range(ps):
                s = s + zp[:, du:du + H, dv:dv + W]
        return s / float(ps * ps)

    def conv_same(img, k):                # img: (H, W); cross-correlation, zero 'same' padding
        return jax.lax.conv_general_dilated(
            img[None, None], k[None, None], window_strides=(1, 1), padding="SAME",
            dimension_numbers=("NCHW", "OIHW", "NCHW"),
            precision=jax.lax.Precision.HIGHEST)[0, 0]

    chans = []
    for c in range(C):
        a = x[:, c]                                           # (B, H, W)
        avg = avg_pool(a)
        avg_sq = avg_pool(a * a)
        ls = jnp.sqrt(jnp.maximum(avg_sq - avg * avg, 1e-6))
        ls = (ls - ls.min()) / (ls.max() - ls.min() + 1e-8)
        rows = []
        for b in range(B):
            t = b % n_thetas
            cr = conv_same(a[b], kc[t])
            sr = conv_same(a[b], ks[t])
            rows.append(jnp.maximum(cr - ls[b] * sr, 0.0))
        chans.append(jnp.stack(rows))                          # (B, H, W)
    return jnp.stack(chans, axis=1)                            # (B, C, H, W)


if __name__ == "__main__":
    key = jax.random.PRNGKey(0)
    B, C, H, W = 2, 4, 16, 16
    n_thetas = 8

    x = jax.random.normal(key, (B, C, H, W), dtype=jnp.float32)

    out = texture_suppression(x, n_thetas=n_thetas)
    out = jax.block_until_ready(out)

    kc, ks = build_gaussian_kernels(n_thetas)
    ref = texture_suppression_reference(x, kc, ks, n_thetas)

    assert out.shape == (B, C, H, W)
    max_err = float(jnp.max(jnp.abs(out - ref)))
    assert jnp.allclose(out, ref, atol=2e-2, rtol=2e-2), \
        f"mismatch vs reference (max abs err {max_err})"

    print("KERNEL_OK")
</pallas_src>

<mosaic_0001>
module attributes {stable_mosaic.version = 11 : i64} {
  func.func @_stats_kernel(%arg0: i32, %arg1: memref<8x256xf32, #tpu.memory_space<vmem>>, %arg2: memref<256x256xf32, #tpu.memory_space<vmem>>, %arg3: memref<8x256xf32, #tpu.memory_space<vmem>>) attributes {dimension_semantics = [#tpu.dimension_semantics<arbitrary>], iteration_bounds = array<i64: 1>, scalar_prefetch = 0 : i64, scratch_operands = 0 : i64, tpu.core_type = #tpu.core_type<tc>, window_params = [{pipeline_mode = #tpu.pipeline_mode<synchronous>, transform_indices = @transform_0, window_bounds = array<i64: 8, 256>}, {pipeline_mode = #tpu.pipeline_mode<synchronous>, transform_indices = @transform_1, window_bounds = array<i64: 256, 256>}, {pipeline_mode = #tpu.pipeline_mode<synchronous>, transform_indices = @transform_2, window_bounds = array<i64: 8, 256>}]} {
    %c0 = arith.constant 0 : index
    %c0_0 = arith.constant 0 : index
    %0 = vector.load %arg1[%c0, %c0_0] : memref<8x256xf32, #tpu.memory_space<vmem>>, vector<8x256xf32>
    %c0_1 = arith.constant 0 : index
    %c0_2 = arith.constant 0 : index
    %1 = vector.load %arg2[%c0_1, %c0_2] : memref<256x256xf32, #tpu.memory_space<vmem>>, vector<256x256xf32>
    %2 = arith.mulf %0, %0 : vector<8x256xf32>
    %3 = tpu.concatenate %0, %2 in 0 : vector<8x256xf32>, vector<8x256xf32> -> vector<16x256xf32>
    %cst = arith.constant dense<0.000000e+00> : vector<16x256xf32>
    %4 = tpu.matmul %3, %1, %cst {dimension_numbers = #tpu.dot_dimension_numbers<[1], [0], [0], [1], [0, 0, 1, 1], [], []>} : vector<16x256xf32>, vector<256x256xf32>, vector<16x256xf32> -> vector<16x256xf32>
    %5 = vector.extract_strided_slice %4 {offsets = [0, 0], sizes = [8, 256], strides = [1, 1]} : vector<16x256xf32> to vector<8x256xf32>
    %6 = vector.extract_strided_slice %4 {offsets = [8, 0], sizes = [8, 256], strides = [1, 1]} : vector<16x256xf32> to vector<8x256xf32>
    %7 = arith.mulf %5, %5 : vector<8x256xf32>
    %8 = arith.subf %6, %7 : vector<8x256xf32>
    %cst_3 = arith.constant 9.99999997E-7 : f32
    %9 = vector.broadcast %cst_3 : f32 to vector<8x256xf32>
    %10 = arith.maximumf %8, %9 : vector<8x256xf32>
    %11 = math.sqrt %10 : vector<8x256xf32>
    %cst_4 = arith.constant dense<0x7F800000> : vector<8xf32>
    %12 = vector.multi_reduction <minimumf>, %11, %cst_4 [1] : vector<8x256xf32> to vector<8xf32>
    %13 = vector.shape_cast %12 : vector<8xf32> to vector<8x1xf32>
    %cst_5 = arith.constant dense<0xFF800000> : vector<8xf32>
    %14 = vector.multi_reduction <maximumf>, %11, %cst_5 [1] : vector<8x256xf32> to vector<8xf32>
    %15 = vector.shape_cast %14 : vector<8xf32> to vector<8x1xf32>
    %16 = vector.extract_strided_slice %13 {offsets = [0, 0], sizes = [4, 1], strides = [1, 1]} : vector<8x1xf32> to vector<4x1xf32>
    %17 = vector.extract_strided_slice %15 {offsets = [0, 0], sizes = [4, 1], strides = [1, 1]} : vector<8x1xf32> to vector<4x1xf32>
    %18 = vector.extract_strided_slice %13 {offsets = [4, 0], sizes = [4, 1], strides = [1, 1]} : vector<8x1xf32> to vector<4x1xf32>
    %19 = arith.minimumf %16, %18 : vector<4x1xf32>
    %20 = vector.extract_strided_slice %15 {offsets = [4, 0], sizes = [4, 1], strides = [1, 1]} : vector<8x1xf32> to vector<4x1xf32>
    %21 = arith.maximumf %17, %20 : vector<4x1xf32>
    %22 = tpu.concatenate %19, %19 in 0 : vector<4x1xf32>, vector<4x1xf32> -> vector<8x1xf32>
    %23 = tpu.concatenate %21, %21 in 0 : vector<4x1xf32>, vector<4x1xf32> -> vector<8x1xf32>
    %24 = vector.broadcast %22 : vector<8x1xf32> to vector<8x256xf32>
    %25 = arith.subf %11, %24 : vector<8x256xf32>
    %26 = arith.subf %23, %22 : vector<8x1xf32>
    %cst_6 = arith.constant 9.99999993E-9 : f32
    %27 = vector.broadcast %cst_6 : f32 to vector<8x1xf32>
    %28 = arith.addf %26, %27 : vector<8x1xf32>
    %29 = vector.broadcast %28 : vector<8x1xf32> to vector<8x256xf32>
    %30 = arith.divf %25, %29 : vector<8x256xf32>
    %c0_7 = arith.constant 0 : index
    %c0_8 = arith.constant 0 : index
    %31 = vector.load %arg3[%c0_7, %c0_8] : memref<8x256xf32, #tpu.memory_space<vmem>>, vector<8x256xf32>
    tpu.vector_store %arg3[%c0_7, %c0_8], %30 {strides = array<i32>} : memref<8x256xf32, #tpu.memory_space<vmem>>, vector<8x256xf32>,
    return
  }
  func.func @transform_0(%arg0: i32) -> (i32, i32) {
    %c0_i32 = arith.constant 0 : i32
    %c0_i32_0 = arith.constant 0 : i32
    %c0_i32_1 = arith.constant 0 : i32
    return %c0_i32, %c0_i32_0 : i32, i32
  }
  func.func @transform_1(%arg0: i32) -> (i32, i32) {
    %c0_i32 = arith.constant 0 : i32
    %c0_i32_0 = arith.constant 0 : i32
    %c0_i32_1 = arith.constant 0 : i32
    return %c0_i32, %c0_i32_0 : i32, i32
  }
  func.func @transform_2(%arg0: i32) -> (i32, i32) {
    %c0_i32 = arith.constant 0 : i32
    %c0_i32_0 = arith.constant 0 : i32
    %c0_i32_1 = arith.constant 0 : i32
    return %c0_i32, %c0_i32_0 : i32, i32
  }
}

</mosaic_0001>

<bundles_post_ra>
// kernel: tpu_custom_call.1
= control target key start
LH: loop header
LB: loop body
LE: loop exit
PB: predicated region body
PF: predicated region fallthrough
CT: control target
= control target key end

     0   :  { %7 = vsyncpa [#allocation3], 0  ;;  %s507_s0 = inlined_call_operand.hbm [shape: f32[8,256], index: 0, kind: input, shape index: {}]   ;;  %s508_s1 = inlined_call_operand.hbm [shape: f32[256,256], index: 1, kind: input, shape index: {}]   ;;  %s509_s2 = inlined_call_operand.hbm [shape: f32[8,256], index: 2, kind: output, shape index: {}]  }
   0x1   :  { %8 = vsyncpa [#allocation6], 0 }
   0x2   :  { %9 = vsyncpa [#allocation4], 0  ;;  %s443_s9 = smov [#allocation2]   ;;  %s444_s11 = smov [#allocation5]  }
   0x3   :  { %s16_s10 = sshll.u32 %s443_s9, 4  ;;  %s25_s12 = sshll.u32 %s444_s11, 4  ;;  %s17_s10 = int_to_ptr.vmem [resolvable:$true] %s16_s10  ;;  %s464_s12 = int_to_ptr.vmem [resolvable:$true] %s25_s12 }
   0x4   :  { %s371_s15 = scalar_lea.hbm %s507_s0, 256 }
   0x5   :  { %p372_p0 = scmp.ne.s32.totalorder %s507_s0, %s371_s15  ;;  %p375_p1 = scmp.lt.u32.totalorder %s371_s15, %s507_s0 }
   0x7   :  { %p377_p2 = pnand %p375_p1, %p372_p0 }
   0x9   :  { %380 = shalt.err (!%p377_p2)
}
   0xa   :  { %s381_s20 = scalar_lea.vmem %s17_s10, 256  ;;  %p386_p4 = scmp.lt.s32.totalorder %s17_s10, %s17_s10 }
   0xb   :  { %p382_p3 = scmp.ne.s32.totalorder %s17_s10, %s381_s20  ;;  %p387_p5 = scmp.lt.s32.totalorder %s381_s20, %s381_s20 }
   0xd   :  { %p388_p6 = por %p387_p5, %p386_p4 }
   0xf   :  { %p389_p7 = pnand %p388_p6, %p382_p3 }
  0x11   :  { %392 = shalt.err (!%p389_p7)
}
  0x12   :  { %19 = dma.hbm_to_vmem [thread:$0]  %s507_s0, 256, %s17_s10, [#allocation3]  }
  0x13   :  { %s393_s25 = scalar_lea.hbm %s508_s1, 8192 }
  0x14   :  { %p394_p8 = scmp.ne.s32.totalorder %s508_s1, %s393_s25  ;;  %p397_p9 = scmp.lt.u32.totalorder %s393_s25, %s508_s1 }
  0x16   :  { %p399_p10 = pnand %p397_p9, %p394_p8 }
  0x18   :  { %402 = shalt.err (!%p399_p10)
}
  0x19   :  { %s403_s30 = scalar_lea.vmem %s464_s12, 8192  ;;  %p408_p12 = scmp.lt.s32.totalorder %s464_s12, %s464_s12 }
  0x1a   :  { %p404_p11 = scmp.ne.s32.totalorder %s464_s12, %s403_s30  ;;  %p409_p13 = scmp.lt.s32.totalorder %s403_s30, %s403_s30 }
  0x1c   :  { %p410_p0 = por %p409_p13, %p408_p12 }
  0x1e   :  { %p411_p1 = pnand %p410_p0, %p404_p11 }
  0x20   :  { %414 = shalt.err (!%p411_p1)
}
  0x21   :  { %s445_s0 = smov 256   ;;  %s446_s3 = smov 16  }
  0x22   :  { %31 = dma.hbm_to_vmem [thread:$0]  %s508_s1, 8192, %s464_s12, [#allocation6], %s445_s0, %s445_s0, %s446_s3  }
  0x23   :  { %437 = dma.done.wait [#allocation3], 256  }
  0x24   :  { %438 = vsyncadd [#allocation3], 4294967040 }
  0x25   :  { %439 = dma.done.wait [#allocation6], 8192  }
  0x26   :  { %440 = vsyncadd [#allocation6], 4294959104  ;;  %v41_v0 = vld [vmem:[#allocation5 + $0x8] sm:$0xff]  ;;  %v43_v1 = vld [vmem:[#allocation5 + $0x18] sm:$0xff]  ;;  %vm220_vm4 = vcmask 1043456   ;;  %s448_s1 = smov [#allocation7]  }
  0x27   :  { %v40_v2 = vld [vmem:[#allocation5] sm:$0xff]  ;;  %v261_v3 = vpack.c.bf16 %v43_v1, %v41_v0  ;;  %v42_v4 = vld [vmem:[#allocation5 + $0x10] sm:$0xff]  ;;  %v45_v5 = vld [vmem:[#allocation5 + $0x28] sm:$0xff]  ;;  %s251_s6 = sshll.u32 %s448_s1, 4  ;;  %s252_s6 = int_to_ptr.vmem [resolvable:$true] %s251_s6 }
  0x28   :  { %v47_v6 = vld [vmem:[#allocation5 + $0x38] sm:$0xff]  ;;  %v263_v7 = vpack.c.bf16 %v42_v4, %v40_v2  ;;  %v44_v9 = vld [vmem:[#allocation5 + $0x20] sm:$0xff]  ;;  %v46_v10 = vld [vmem:[#allocation5 + $0x30] sm:$0xff]  ;;  %s415_s7 = scalar_lea.vmem %s252_s6, 256  ;;  %p420_p3 = scmp.lt.s32.totalorder %s252_s6, %s252_s6 }
  0x29   :  { %v265_v8 = vpack.c.bf16 %v47_v6, %v45_v5  ;;  %v49_v11 = vld [vmem:[#allocation5 + $0x48] sm:$0xff]  ;;  %262 = vmatprep.subr.bf16.mxu0 %v261_v3  ;;  %325 = vmatprep.subr.bf16.mxu1 %v261_v3  ;;  %v51_v12 = vld [vmem:[#allocation5 + $0x58] sm:$0xff]  ;;  %v267_v13 = vpack.c.bf16 %v46_v10, %v44_v9  ;;  %v48_v15 = vld [vmem:[#allocation5 + $0x40] sm:$0xff]  ;;  %p416_p2 = scmp.ne.s32.totalorder %s252_s6, %s415_s7  ;;  %p421_p4 = scmp.lt.s32.totalorder %s415_s7, %s415_s7 }
  0x2a   :  { %264 = vmatpush1.bf16.msra.mxu0 %v263_v7  ;;  %341 = vmatpush1.bf16.msra.mxu1 %v263_v7  ;;  %v269_v14 = vpack.c.bf16 %v51_v12, %v49_v11  ;;  %v50_v16 = vld [vmem:[#allocation5 + $0x50] sm:$0xff]  ;;  %v53_v17 = vld [vmem:[#allocation5 + $0x68] sm:$0xff]  ;;  %v55_v18 = vld [vmem:[#allocation5 + $0x78] sm:$0xff] }
  0x2b   :  { %266 = vmatprep.subr.bf16.mxu0 %v265_v8  ;;  %326 = vmatprep.subr.bf16.mxu1 %v265_v8  ;;  %v271_v19 = vpack.c.bf16 %v50_v16, %v48_v15  ;;  %v273_v20 = vpack.c.bf16 %v55_v18, %v53_v17  ;;  %v52_v21 = vld [vmem:[#allocation5 + $0x60] sm:$0xff]  ;;  %v54_v22 = vld [vmem:[#allocation5 + $0x70] sm:$0xff]  ;;  %v57_v23 = vld [vmem:[#allocation5 + $0x88] sm:$0xff]  ;;  %p422_p5 = por %p421_p4, %p420_p3 }
  0x2c   :  { %v59_v24 = vld [vmem:[#allocation5 + $0x98] sm:$0xff]  ;;  %v275_v25 = vpack.c.bf16 %v54_v22, %v52_v21  ;;  %v56_v27 = vld [vmem:[#allocation5 + $0x80] sm:$0xff]  ;;  %v58_v28 = vld [vmem:[#allocation5 + $0x90] sm:$0xff] }
  0x2d   :  { %v277_v26 = vpack.c.bf16 %v59_v24, %v57_v23  ;;  %v61_v29 = vld [vmem:[#allocation5 + $0xa8] sm:$0xff]  ;;  %v63_v30 = vld [vmem:[#allocation5 + $0xb8] sm:$0xff]  ;;  %v279_v31 = vpack.c.bf16 %v58_v28, %v56_v27  ;;  %v60_v33 = vld [vmem:[#allocation5 + $0xa0] sm:$0xff]  ;;  %p423_p6 = pnand %p422_p5, %p416_p2 }
  0x2e   :  { %268 = vmatpush1.bf16.msra.mxu0 %v267_v13  ;;  %342 = vmatpush1.bf16.msra.mxu1 %v267_v13  ;;  %v281_v32 = vpack.c.bf16 %v63_v30, %v61_v29  ;;  %v62_v34 = vld [vmem:[#allocation5 + $0xb0] sm:$0xff]  ;;  %v65_v35 = vld [vmem:[#allocation5 + $0xc8] sm:$0xff]  ;;  %v67_v36 = vld [vmem:[#allocation5 + $0xd8] sm:$0xff] }
  0x2f   :  { %270 = vmatprep.subr.bf16.mxu0 %v269_v14  ;;  %327 = vmatprep.subr.bf16.mxu1 %v269_v14  ;;  %v283_v37 = vpack.c.bf16 %v62_v34, %v60_v33  ;;  %v285_v38 = vpack.c.bf16 %v67_v36, %v65_v35  ;;  %v64_v39 = vld [vmem:[#allocation5 + $0xc0] sm:$0xff]  ;;  %v66_v40 = vld [vmem:[#allocation5 + $0xd0] sm:$0xff]  ;;  %v39_v41 = vld [vmem:[#allocation2 + $0x8] sm:$0xff] }
  0x30   :  { %v69_v42 = vld [vmem:[#allocation5 + $0xe8] sm:$0xff]  ;;  %v71_v43 = vld [vmem:[#allocation5 + $0xf8] sm:$0xff]  ;;  %170 = vmatprep.mubr.f32.mxu0 %v39_v41  ;;  %v105_v44 = vmul.f32 %v39_v41, %v39_v41  ;;  %v287_v45 = vpack.c.bf16 %v66_v40, %v64_v39  ;;  %v68_v47 = vld [vmem:[#allocation5 + $0xe0] sm:$0xff] }
  0x31   :  { %v289_v46 = vpack.c.bf16 %v71_v43, %v69_v42  ;;  %v70_v48 = vld [vmem:[#allocation5 + $0xf0] sm:$0xff]  ;;  %v73_v49 = vld [vmem:[#allocation5 + $0x108] sm:$0xff]  ;;  %v75_v50 = vld [vmem:[#allocation5 + $0x118] sm:$0xff] }
  0x32   :  { %272 = vmatpush1.bf16.msra.mxu0 %v271_v19  ;;  %343 = vmatpush1.bf16.msra.mxu1 %v271_v19  ;;  %v291_v51 = vpack.c.bf16 %v70_v48, %v68_v47  ;;  %v293_v52 = vpack.c.bf16 %v75_v50, %v73_v49  ;;  %v72_v53 = vld [vmem:[#allocation5 + $0x100] sm:$0xff]  ;;  %v74_v54 = vld [vmem:[#allocation5 + $0x110] sm:$0xff]  ;;  %v77_v55 = vld [vmem:[#allocation5 + $0x128] sm:$0xff] }
  0x33   :  { %274 = vmatprep.subr.bf16.mxu0 %v273_v20  ;;  %328 = vmatprep.subr.bf16.mxu1 %v273_v20  ;;  %v79_v56 = vld [vmem:[#allocation5 + $0x138] sm:$0xff]  ;;  %v295_v57 = vpack.c.bf16 %v74_v54, %v72_v53  ;;  %v76_v59 = vld [vmem:[#allocation5 + $0x120] sm:$0xff]  ;;  %v78_v60 = vld [vmem:[#allocation5 + $0x130] sm:$0xff] }
  0x34   :  { %176 = vmatprep.mubr.f32.mxu1 %v105_v44  ;;  %v297_v58 = vpack.c.bf16 %v79_v56, %v77_v55  ;;  %v81_v61 = vld [vmem:[#allocation5 + $0x148] sm:$0xff]  ;;  %v83_v62 = vld [vmem:[#allocation5 + $0x158] sm:$0xff]  ;;  %v299_v63 = vpack.c.bf16 %v78_v60, %v76_v59  ;;  %v80_v1 = vld [vmem:[#allocation5 + $0x140] sm:$0xff] }
  0x35   :  { %v301_v0 = vpack.c.bf16 %v83_v62, %v81_v61  ;;  %v82_v2 = vld [vmem:[#allocation5 + $0x150] sm:$0xff]  ;;  %v85_v3 = vld [vmem:[#allocation5 + $0x168] sm:$0xff]  ;;  %v87_v4 = vld [vmem:[#allocation5 + $0x178] sm:$0xff] }
  0x36   :  { %276 = vmatpush1.bf16.msra.mxu0 %v275_v25  ;;  %344 = vmatpush1.bf16.msra.mxu1 %v275_v25  ;;  %v303_v5 = vpack.c.bf16 %v82_v2, %v80_v1  ;;  %v305_v6 = vpack.c.bf16 %v87_v4, %v85_v3  ;;  %v84_v7 = vld [vmem:[#allocation5 + $0x160] sm:$0xff]  ;;  %v86_v8 = vld [vmem:[#allocation5 + $0x170] sm:$0xff]  ;;  %v89_v9 = vld [vmem:[#allocation5 + $0x188] sm:$0xff] }
  0x37   :  { %278 = vmatprep.subr.bf16.mxu0 %v277_v26  ;;  %329 = vmatprep.subr.bf16.mxu1 %v277_v26  ;;  %v91_v10 = vld [vmem:[#allocation5 + $0x198] sm:$0xff]  ;;  %v307_v11 = vpack.c.bf16 %v86_v8, %v84_v7  ;;  %v88_v13 = vld [vmem:[#allocation5 + $0x180] sm:$0xff]  ;;  %v90_v14 = vld [vmem:[#allocation5 + $0x190] sm:$0xff] }
  0x38   :  { %v309_v12 = vpack.c.bf16 %v91_v10, %v89_v9  ;;  %v93_v15 = vld [vmem:[#allocation5 + $0x1a8] sm:$0xff]  ;;  %v95_v16 = vld [vmem:[#allocation5 + $0x1b8] sm:$0xff]  ;;  %v311_v17 = vpack.c.bf16 %v90_v14, %v88_v13  ;;  %v92_v19 = vld [vmem:[#allocation5 + $0x1a0] sm:$0xff] }
  0x39   :  { %v313_v18 = vpack.c.bf16 %v95_v16, %v93_v15  ;;  %v94_v20 = vld [vmem:[#allocation5 + $0x1b0] sm:$0xff]  ;;  %v97_v21 = vld [vmem:[#allocation5 + $0x1c8] sm:$0xff]  ;;  %v99_v22 = vld [vmem:[#allocation5 + $0x1d8] sm:$0xff] }
  0x3a   :  { %280 = vmatpush1.bf16.msra.mxu0 %v279_v31  ;;  %345 = vmatpush1.bf16.msra.mxu1 %v279_v31  ;;  %v315_v23 = vpack.c.bf16 %v94_v20, %v92_v19  ;;  %v317_v24 = vpack.c.bf16 %v99_v22, %v97_v21  ;;  %v96_v25 = vld [vmem:[#allocation5 + $0x1c0] sm:$0xff]  ;;  %v98_v26 = vld [vmem:[#allocation5 + $0x1d0] sm:$0xff]  ;;  %v101_v27 = vld [vmem:[#allocation5 + $0x1e8] sm:$0xff] }
  0x3b   :  { %282 = vmatprep.subr.bf16.mxu0 %v281_v32  ;;  %330 = vmatprep.subr.bf16.mxu1 %v281_v32  ;;  %v103_v28 = vld [vmem:[#allocation5 + $0x1f8] sm:$0xff]  ;;  %v319_v29 = vpack.c.bf16 %v98_v26, %v96_v25  ;;  %v100_v31 = vld [vmem:[#allocation5 + $0x1e0] sm:$0xff]  ;;  %v102_v32 = vld [vmem:[#allocation5 + $0x1f0] sm:$0xff] }
  0x3c   :  { %v321_v30 = vpack.c.bf16 %v103_v28, %v101_v27  ;;  %v323_v33 = vpack.c.bf16 %v102_v32, %v100_v31  ;;  %v38_v34 = vld [vmem:[#allocation2] sm:$0xff] }
  0x3d   :  { %v104_v35 = vmul.f32 %v38_v34, %v38_v34 }
  0x3e   :  { %284 = vmatpush1.bf16.msra.mxu0 %v283_v37  ;;  %346 = vmatpush1.bf16.msra.mxu1 %v283_v37 }
  0x3f   :  { %286 = vmatprep.subr.bf16.mxu0 %v285_v38  ;;  %331 = vmatprep.subr.bf16.mxu1 %v285_v38 }
  0x42   :  { %288 = vmatpush1.bf16.msra.mxu0 %v287_v45  ;;  %347 = vmatpush1.bf16.msra.mxu1 %v287_v45 }
  0x43   :  { %290 = vmatprep.subr.bf16.mxu0 %v289_v46  ;;  %332 = vmatprep.subr.bf16.mxu1 %v289_v46 }
  0x46   :  { %292 = vmatpush1.bf16.msra.mxu0 %v291_v51  ;;  %348 = vmatpush1.bf16.msra.mxu1 %v291_v51 }
  0x47   :  { %294 = vmatprep.subr.bf16.mxu0 %v293_v52  ;;  %333 = vmatprep.subr.bf16.mxu1 %v293_v52 }
  0x4a   :  { %296 = vmatpush1.bf16.msra.mxu0 %v295_v57  ;;  %349 = vmatpush1.bf16.msra.mxu1 %v295_v57 }
  0x4b   :  { %298 = vmatprep.subr.bf16.mxu0 %v297_v58  ;;  %334 = vmatprep.subr.bf16.mxu1 %v297_v58  ;;  %v447_v58 = vmov 0  }
  0x4c   :  { %363 = vset.pattern.permute.xlu1 %v447_v58  ;;  %364 = vset.pattern.permute.xlu0 %v447_v58 }
  0x4e   :  { %300 = vmatpush1.bf16.msra.mxu0 %v299_v63  ;;  %350 = vmatpush1.bf16.msra.mxu1 %v299_v63 }
  0x4f   :  { %302 = vmatprep.subr.bf16.mxu0 %v301_v0  ;;  %335 = vmatprep.subr.bf16.mxu1 %v301_v0 }
  0x52   :  { %304 = vmatpush1.bf16.msra.mxu0 %v303_v5  ;;  %351 = vmatpush1.bf16.msra.mxu1 %v303_v5 }
  0x53   :  { %306 = vmatprep.subr.bf16.mxu0 %v305_v6  ;;  %336 = vmatprep.subr.bf16.mxu1 %v305_v6 }
  0x56   :  { %308 = vmatpush1.bf16.msra.mxu0 %v307_v11  ;;  %352 = vmatpush1.bf16.msra.mxu1 %v307_v11 }
  0x57   :  { %310 = vmatprep.subr.bf16.mxu0 %v309_v12  ;;  %337 = vmatprep.subr.bf16.mxu1 %v309_v12 }
  0x5a   :  { %312 = vmatpush1.bf16.msra.mxu0 %v311_v17  ;;  %353 = vmatpush1.bf16.msra.mxu1 %v311_v17 }
  0x5b   :  { %314 = vmatprep.subr.bf16.mxu0 %v313_v18  ;;  %338 = vmatprep.subr.bf16.mxu1 %v313_v18 }
  0x5e   :  { %316 = vmatpush1.bf16.msra.mxu0 %v315_v23  ;;  %354 = vmatpush1.bf16.msra.mxu1 %v315_v23 }
  0x5f   :  { %318 = vmatprep.subr.bf16.mxu0 %v317_v24  ;;  %339 = vmatprep.subr.bf16.mxu1 %v317_v24 }
  0x62   :  { %320 = vmatpush1.bf16.msra.mxu0 %v319_v29  ;;  %355 = vmatpush1.bf16.msra.mxu1 %v319_v29 }
  0x63   :  { %322 = vmatprep.subr.bf16.mxu0 %v321_v30  ;;  %340 = vmatprep.subr.bf16.mxu1 %v321_v30 }
  0x66   :  { %324 = vmatpush1.bf16.msra.mxu0 %v323_v33  ;;  %356 = vmatpush1.bf16.msra.mxu1 %v323_v33 }
  0x69   :  { %171 = vmatmul.mubr.f32.vlgmr.msra.gmra.mrb[0].mxu0 %v38_v34  ;;  %177 = vmatmul.mubr.f32.vlgmr.msra.gmra.mrb[0].mxu1 %v104_v35 }
 0x13c   :  { %v172_v36 = vpop.f32.mrb[0].mxu0  ;;  %v178_v37 = vpop.f32.mrb[0].mxu1 }
 0x13d   :  { %v183_v38 = vmul.f32 %v172_v36, %v172_v36  ;;  %v174_v39 = vpop.f32.mrb[1].mxu0  ;;  %v180_v40 = vpop.f32.mrb[1].mxu1 }
 0x13e   :  { %v184_v41 = vmul.f32 %v174_v39, %v174_v39 }
 0x13f   :  { %v185_v42 = vsub.f32 %v178_v37, %v183_v38 }
 0x140   :  { %v186_v43 = vsub.f32 %v180_v40, %v184_v41 }
 0x141   :  { %v187_v44 = vmax.f32 %v185_v42, 1e-06 }
 0x142   :  { %v188_v45 = vmax.f32 %v186_v43, 1e-06 }
 0x143   :  { %365 = vrsqrt.f32 %v187_v44  ;;  %vm191_vm0 = vcmp.eq.f32.partialorder %v187_v44, inf  ;;  %v194_v49 = vand.u32 2147483648, %v187_v44  ;;  %vm193_vm1 = vcmp.eq.f32.partialorder %v187_v44, 0.0 }
 0x144   :  { %367 = vrsqrt.f32 %v188_v45  ;;  %vm198_vm2 = vcmp.eq.f32.partialorder %v188_v45, inf  ;;  %v201_v52 = vand.u32 2147483648, %v188_v45  ;;  %vm200_vm3 = vcmp.eq.f32.partialorder %v188_v45, 0.0 }
 0x14d   :  { %v366_v46 = vpop.eup %365 }
 0x14e   :  { %v368_v47 = vpop.eup %367  ;;  %v190_v48 = vmul.f32 %v366_v46, %v187_v44 }
 0x14f   :  { %v197_v50 = vmul.f32 %v368_v47, %v188_v45 }
 0x150   :  { %v192_v51 = vsel %vm191_vm0, %v187_v44, %v190_v48 }
 0x151   :  { %v195_v53 = vsel %vm193_vm1, %v194_v49, %v192_v51  ;;  %v199_v54 = vsel %vm198_vm2, %v188_v45, %v197_v50 }
 0x152   :  { %v202_v55 = vsel %vm200_vm3, %v201_v52, %v199_v54 }
 0x153   :  { %v203_v56 = vmin.f32 %v195_v53, %v202_v55  ;;  %v206_v57 = vmax.f32 %v195_v53, %v202_v55 }
 0x155   :  { %204 = vmin.xlane.f32.xlu0 %v203_v56 }
 0x159   :  { %207 = vmax.xlane.f32.xlu0 %v206_v57 }
 0x1e2   :  { %v205_v59 = vpop.xlane.xlu0 %204 }
 0x1e3   :  { %v210_v60 = vrot.slane %v205_v59, 4 }
 0x1e5   :  { %v212_v61 = vmin.f32 %v205_v59, %v210_v60 }
 0x1e6   :  { %v208_v62 = vpop.xlane.xlu0 %207 }
 0x1e7   :  { %v214_v63 = vrot.slane %v208_v62, 4  ;;  %v218_v0 = vrot.slane %v212_v61, 4 }
 0x1e9   :  { %v216_v1 = vmax.f32 %v208_v62, %v214_v63  ;;  %v221_v3 = vsel %vm220_vm4, %v212_v61, %v218_v0 }
 0x1eb   :  { %v223_v2 = vrot.slane %v216_v1, 4 }
 0x1ed   :  { %v225_v4 = vsel %vm220_vm4, %v216_v1, %v223_v2 }
 0x1ee   :  { %v233_v5 = vsub.f32 %v225_v4, %v221_v3 }
 0x1f0   :  { %v234_v6 = vadd.f32 1e-08, %v233_v5 }
 0x1f2   :  { %237 = vperm.xlu1 %363, %v234_v6  }
 0x1f6   :  { %228 = vperm.xlu1 %363, %v221_v3  }
 0x271   :  { %v238_v7 = vpop.permute.xlu1 %237 }
 0x272   :  { %369 = vrcp.f32 %v238_v7 }
 0x275   :  { %v229_v8 = vpop.permute.xlu1 %228 }
 0x276   :  { %v231_v9 = vsub.f32 %v195_v53, %v229_v8  ;;  %v232_v10 = vsub.f32 %v202_v55, %v229_v8 }
 0x27c   :  { %v370_v11 = vpop.eup %369 }
 0x27d   :  { %v241_v12 = vmul.f32 %v370_v11, %v231_v9  ;;  %v242_v13 = vmul.f32 %v370_v11, %v232_v10 }
 0x27f   :  { %243 = vst [vmem:[#allocation7] sm:$0xff] %v241_v12  ;;  %244 = vst [vmem:[#allocation7 + $0x8] sm:$0xff] %v242_v13 }
 0x280   :  { %426 = shalt.err (!%p423_p6)
}
 0x281   :  { %s427_s10 = scalar_lea.hbm %s509_s2, 256 }
 0x282   :  { %p428_p7 = scmp.ne.s32.totalorder %s509_s2, %s427_s10  ;;  %p431_p8 = scmp.lt.u32.totalorder %s427_s10, %s509_s2 }
 0x284   :  { %p433_p9 = pnand %p431_p8, %p428_p7 }
 0x286   :  { %436 = shalt.err (!%p433_p9)
}
 0x287   :  { %254 = dma.vmem_to_hbm [thread:$0]  %s252_s6, 256, %s509_s2, [#allocation4]  }
 0x288   :  { %441 = dma.done.wait [#allocation4], 256  }
 0x289   :  { %442 = vsyncadd [#allocation4], 4294967040 }
 0x28a   :  { %258 = vsyncpa [#allocation3], 1 }
 0x28b   :  { %259 = vsyncpa [#allocation6], 1 }
 0x28c   :  { %260 = vsyncpa [#allocation4], 1 }

</bundles_post_ra>
